<compile_context>
chip_gen: v7x
topology: tpu7x:2x2x1
jax: 0.10.0
libtpu: 0.0.40
codegen_flags: <defaults>
</compile_context>

<pallas_src>
import functools

import jax
import jax.numpy as jnp
from jax.experimental import pallas as pl
from jax.experimental.pallas import tpu as pltpu

EMBED_DIM = 64
HIDDEN_DIMS = [128, 64, 32]
BN_EPS = 1e-5
DEFAULT_TILE_B = 4096   # sweep 2048-8192; must stay a multiple of 128
MAX_TILE_B = 8192


def _round_up(x, m):
    return (x + m - 1) // m * m


def _padded_bytes(shape, dtype):
    """Approximate VMEM footprint: sublanes padded to 8, lanes padded to 128."""
    itemsize = jnp.dtype(dtype).itemsize
    if len(shape) == 1:
        return _round_up(shape[0], 128) * itemsize
    lead = 1
    for d in shape[:-2]:
        lead *= d
    return lead * _round_up(shape[-2], 8) * _round_up(shape[-1], 128) * itemsize


# --------------------------------------------------------------------------
# Kernel
# --------------------------------------------------------------------------
def _ranknet_kernel(u_ref, it_ref, w1u_ref, w1i_ref, b1_ref, w2_ref, b2_ref,
                    w3_ref, b3_ref, wo_ref, bo_ref, out_ref):
    cdt = w1u_ref.dtype   # MXU operand dtype (bf16 by default)
    idt = b1_ref.dtype    # inter-layer epilogue dtype (bf16 on v6e/v7x, f32 on v5e)

    # Block 1: embeddings + Linear1 + BN1 folded -> two small-K dots, bias, ReLU.
    h = jnp.dot(u_ref[...].astype(cdt), w1u_ref[...], preferred_element_type=idt)
    h = h + jnp.dot(it_ref[...].astype(cdt), w1i_ref[...], preferred_element_type=idt)
    h = jnp.maximum(h + b1_ref[...], 0.0)

    # Block 2: Linear2 + BN2 folded.
    h = jnp.dot(h.astype(cdt), w2_ref[...], preferred_element_type=idt)
    h = jnp.maximum(h + b2_ref[...], 0.0)

    # Block 3: Linear3 + BN3 folded.  Keep accumulation + epilogue in f32.
    h = jnp.dot(h.astype(cdt), w3_ref[...], preferred_element_type=jnp.float32)
    h = jnp.maximum(h + b3_ref[...], 0.0)

    # Output layer (N=1): VPU broadcast-multiply + lane reduction (no idle MXU
    # pass).  The batch rows are regrouped (layout-free leading-dim split) so
    # the result is stored lane-dense as (tile_b//128, 128).
    tile_g = out_ref.shape[1]
    h = h.reshape(tile_g, 128, h.shape[-1])
    s = jnp.sum(h * wo_ref[...], axis=-1) + bo_ref[...]     # (tile_g, 128) f32
    out_ref[...] = s.reshape(out_ref.shape)


# --------------------------------------------------------------------------
# Parameter construction / folding (plain JAX glue)
# --------------------------------------------------------------------------
def init_params(key, user_feat_dim, item_feat_dim,
                embedding_dim=EMBED_DIM, hidden_dims=HIDDEN_DIMS):
    """Deterministic synthetic parameters (shapes follow the nn.Module)."""
    params = {}

    def linear(key, fan_in, fan_out):
        kw, kb = jax.random.split(key)
        bound = 1.0 / jnp.sqrt(fan_in)
        w = jax.random.uniform(kw, (fan_in, fan_out), jnp.float32, -bound, bound)
        b = jax.random.uniform(kb, (1, fan_out), jnp.float32, -bound, bound)
        return w, b

    keys = jax.random.split(key, 9)
    params["wu"], params["bu"] = linear(keys[0], user_feat_dim, embedding_dim)
    params["wi"], params["bi"] = linear(keys[1], item_feat_dim, embedding_dim)

    in_dim = embedding_dim * 2
    for li, hdim in enumerate(hidden_dims, start=1):
        w, b = linear(keys[1 + li], in_dim, hdim)
        params[f"w{li}"], params[f"b{li}"] = w, b
        kg, kb2, km, kv = jax.random.split(keys[4 + li], 4)
        params[f"gamma{li}"] = 1.0 + 0.1 * jax.random.normal(kg, (1, hdim), jnp.float32)
        params[f"beta{li}"] = 0.1 * jax.random.normal(kb2, (1, hdim), jnp.float32)
        params[f"mean{li}"] = 0.1 * jax.random.normal(km, (1, hdim), jnp.float32)
        params[f"var{li}"] = 1.0 + 0.1 * jax.random.uniform(kv, (1, hdim), jnp.float32)
        in_dim = hdim

    params["wo"], params["bo"] = linear(keys[8], hidden_dims[-1], 1)
    return params


def _fold_params(params, compute_dtype, epilogue_dtype):
    """Fold embeddings + eval-mode BN into the Linear weights (exact algebra)."""
    E = params["wu"].shape[1]
    w1 = params["w1"]
    w1_u_half, w1_i_half = w1[:E], w1[E:]

    # Embedding Linears composed with the user/item halves of W1.
    w1u = params["wu"] @ w1_u_half                         # [user_dim, H1]
    w1i = params["wi"] @ w1_i_half                         # [item_dim, H1]
    b1 = params["bu"] @ w1_u_half + params["bi"] @ w1_i_half + params["b1"]

    def bn_fold(li):
        scale = params[f"gamma{li}"] / jnp.sqrt(params[f"var{li}"] + BN_EPS)
        shift = params[f"beta{li}"] - params[f"mean{li}"] * scale
        return scale, shift

    s1, t1 = bn_fold(1)
    s2, t2 = bn_fold(2)
    s3, t3 = bn_fold(3)

    w1u = (w1u * s1).astype(compute_dtype)
    w1i = (w1i * s1).astype(compute_dtype)
    b1 = (b1 * s1 + t1).astype(epilogue_dtype)
    w2 = (params["w2"] * s2).astype(compute_dtype)
    b2 = (params["b2"] * s2 + t2).astype(epilogue_dtype)
    w3 = (params["w3"] * s3).astype(compute_dtype)
    b3 = params["b3"] * s3 + t3                            # f32 (final accuracy)
    wo_row = params["wo"].T                                # [1, H3], f32
    bo = params["bo"]                                      # [1, 1], f32
    return w1u, w1i, b1, w2, b2, w3, b3, wo_row, bo


# --------------------------------------------------------------------------
# Forward wrapper
# --------------------------------------------------------------------------
@functools.partial(jax.jit,
                   static_argnames=("tile_b", "compute_dtype", "epilogue_dtype"))
def ranknet_forward(params, user_features, item_features, tile_b=None,
                    compute_dtype=jnp.bfloat16, epilogue_dtype=None):
    """Pallas forward.  Returns scores of shape [B] (matches scores.squeeze(-1)).

    compute_dtype : MXU operand dtype for the folded weights (bf16 default).
    epilogue_dtype: dtype of the inter-layer bias+ReLU (defaults to
                    compute_dtype; pass jnp.float32 on v5e, whose VPU has no
                    bf16 VALU).
    """
    if epilogue_dtype is None:
        epilogue_dtype = compute_dtype

    B, user_dim = user_features.shape
    item_dim = item_features.shape[1]

    folded = _fold_params(params, compute_dtype, epilogue_dtype)
    w1u, w1i, b1, w2, b2, w3, b3, wo_row, bo = folded

    # --- batch tile selection -------------------------------------------------
    # Big tiles amortize the ~0.35us/grid-step overhead; keep >=2 steps when B
    # allows so v7x's two TensorCores both get work; multiple of 128 keeps the
    # bf16 sublane packing clean and the output lane-dense.
    if tile_b is None:
        tile_b = min(DEFAULT_TILE_B, _round_up(pl.cdiv(B, 2), 128))
    tile_b = int(tile_b)
    tile_b = max(128, _round_up(tile_b, 128))
    tile_b = min(tile_b, MAX_TILE_B)
    tile_g = tile_b // 128

    num_tiles = pl.cdiv(B, tile_b)     # partial final block handled by Pallas
    grid = (num_tiles,)

    def resident(arr):
        # Full-array block with a constant index_map -> stays VMEM-resident
        # across grid steps (no re-DMA).
        return pl.BlockSpec(arr.shape, lambda i: (0,) * arr.ndim)

    in_specs = [
        pl.BlockSpec((tile_b, user_dim), lambda i: (i, 0)),
        pl.BlockSpec((tile_b, item_dim), lambda i: (i, 0)),
        resident(w1u), resident(w1i), resident(b1),
        resident(w2), resident(b2),
        resident(w3), resident(b3),
        resident(wo_row), resident(bo),
    ]
    out_specs = pl.BlockSpec((1, tile_g, 128), lambda i: (i, 0, 0))

    # --- scoped-VMEM budget from the real (lane-padded) footprint --------------
    est = (2 * (_padded_bytes((tile_b, user_dim), user_features.dtype)
                + _padded_bytes((tile_b, item_dim), item_features.dtype))   # 2x in
           + 2 * _padded_bytes((1, tile_g, 128), jnp.float32)               # 2x out
           + sum(_padded_bytes(a.shape, a.dtype) for a in folded)           # weights
           + 4 * _padded_bytes((tile_b, 128), jnp.float32))                 # activations
    vmem_limit = int(min(48 * 1024 * 1024, max(32 * 1024 * 1024, 2 * est)))

    out = pl.pallas_call(
        _ranknet_kernel,
        out_shape=jax.ShapeDtypeStruct((num_tiles, tile_g, 128), jnp.float32),
        grid=grid,
        in_specs=in_specs,
        out_specs=out_specs,
        compiler_params=pltpu.CompilerParams(
            dimension_semantics=("parallel",),
            vmem_limit_bytes=vmem_limit,
        ),
    )(user_features, item_features, w1u, w1i, b1, w2, b2, w3, b3, wo_row, bo)

    # Lane-dense (tiles, tile_g, 128) -> flat [B] scores (reshape is free,
    # the [:B] slice only touches the output bytes).
    return out.reshape(-1)[:B]


# --------------------------------------------------------------------------
# Pure-JAX reference (f32, matches the nn.Module eval-mode forward)
# --------------------------------------------------------------------------
def ranknet_reference(params, user_features, item_features):
    u = user_features @ params["wu"] + params["bu"]
    v = item_features @ params["wi"] + params["bi"]
    h = jnp.concatenate([u, v], axis=1)
    for li in (1, 2, 3):
        h = h @ params[f"w{li}"] + params[f"b{li}"]
        scale = params[f"gamma{li}"] / jnp.sqrt(params[f"var{li}"] + BN_EPS)
        shift = params[f"beta{li}"] - params[f"mean{li}"] * scale
        h = jnp.maximum(h * scale + shift, 0.0)
    out = h @ params["wo"] + params["bo"]
    return jnp.squeeze(out, axis=-1)


if __name__ == "__main__":
    USER_FEAT_DIM = 16
    ITEM_FEAT_DIM = 24

    key = jax.random.PRNGKey(0)
    k_params, k_user, k_item = jax.random.split(key, 3)
    params = init_params(k_params, USER_FEAT_DIM, ITEM_FEAT_DIM)

    # --- Small batch, single (partial) tile ---
    B = 8
    uf = jax.random.normal(k_user, (B, USER_FEAT_DIM), jnp.float32)
    itf = jax.random.normal(k_item, (B, ITEM_FEAT_DIM), jnp.float32)
    ref = ranknet_reference(params, uf, itf)

    # f32 everywhere: only exact algebraic folds differ -> tight tolerance.
    out_f32 = jax.block_until_ready(
        ranknet_forward(params, uf, itf, compute_dtype=jnp.float32))
    assert out_f32.shape == (B,)
    assert jnp.allclose(out_f32, ref, atol=1e-3, rtol=1e-3), (out_f32, ref)

    # Default (v6e/v7x): bf16 MXU operands + bf16 inter-layer epilogues.
    out_bf16 = jax.block_until_ready(ranknet_forward(params, uf, itf))
    assert out_bf16.shape == (B,)
    assert jnp.allclose(out_bf16, ref, atol=1e-1, rtol=1e-1), (out_bf16, ref)

    # v5e configuration: bf16 MXU operands, f32 epilogues.
    out_v5e = jax.block_until_ready(
        ranknet_forward(params, uf, itf, epilogue_dtype=jnp.float32))
    assert jnp.allclose(out_v5e, ref, atol=1e-1, rtol=1e-1), (out_v5e, ref)

    # --- Multi-tile grid with a partial final block (no padding copies) ---
    B2 = 300
    k_u2, k_i2 = jax.random.split(jax.random.PRNGKey(1))
    uf2 = jax.random.normal(k_u2, (B2, USER_FEAT_DIM), jnp.float32)
    itf2 = jax.random.normal(k_i2, (B2, ITEM_FEAT_DIM), jnp.float32)
    ref2 = ranknet_reference(params, uf2, itf2)

    out2 = jax.block_until_ready(
        ranknet_forward(params, uf2, itf2, tile_b=128, compute_dtype=jnp.float32))
    assert out2.shape == (B2,)
    assert jnp.allclose(out2, ref2, atol=1e-3, rtol=1e-3), (out2, ref2)

    # Auto tile selection (>= 2 grid steps so both v7x TensorCores get work).
    out3 = jax.block_until_ready(ranknet_forward(params, uf2, itf2))
    assert out3.shape == (B2,)
    assert jnp.allclose(out3, ref2, atol=1e-1, rtol=1e-1), (out3, ref2)

    print("KERNEL_OK")
</pallas_src>

<mosaic_0001>
module attributes {stable_mosaic.version = 11 : i64} {
  func.func @_ranknet_kernel(%arg0: i32, %arg1: memref<128x16xf32, #tpu.memory_space<vmem>>, %arg2: memref<128x24xf32, #tpu.memory_space<vmem>>, %arg3: memref<16x128xf32, #tpu.memory_space<vmem>>, %arg4: memref<24x128xf32, #tpu.memory_space<vmem>>, %arg5: memref<1x128xf32, #tpu.memory_space<vmem>>, %arg6: memref<128x64xf32, #tpu.memory_space<vmem>>, %arg7: memref<1x64xf32, #tpu.memory_space<vmem>>, %arg8: memref<64x32xf32, #tpu.memory_space<vmem>>, %arg9: memref<1x32xf32, #tpu.memory_space<vmem>>, %arg10: memref<1x32xf32, #tpu.memory_space<vmem>>, %arg11: memref<1x1xf32, #tpu.memory_space<vmem>>, %arg12: memref<1x1x128xf32, #tpu.memory_space<vmem>>) attributes {dimension_semantics = [#tpu.dimension_semantics<parallel>], iteration_bounds = array<i64: 1>, scalar_prefetch = 0 : i64, scratch_operands = 0 : i64, tpu.core_type = #tpu.core_type<tc>, window_params = [{transform_indices = @transform_0, window_bounds = array<i64: 128, 16>}, {transform_indices = @transform_1, window_bounds = array<i64: 128, 24>}, {pipeline_mode = #tpu.pipeline_mode<synchronous>, transform_indices = @transform_2, window_bounds = array<i64: 16, 128>}, {pipeline_mode = #tpu.pipeline_mode<synchronous>, transform_indices = @transform_3, window_bounds = array<i64: 24, 128>}, {pipeline_mode = #tpu.pipeline_mode<synchronous>, transform_indices = @transform_4, window_bounds = array<i64: 1, 128>}, {pipeline_mode = #tpu.pipeline_mode<synchronous>, transform_indices = @transform_5, window_bounds = array<i64: 128, 64>}, {pipeline_mode = #tpu.pipeline_mode<synchronous>, transform_indices = @transform_6, window_bounds = array<i64: 1, 64>}, {pipeline_mode = #tpu.pipeline_mode<synchronous>, transform_indices = @transform_7, window_bounds = array<i64: 64, 32>}, {pipeline_mode = #tpu.pipeline_mode<synchronous>, transform_indices = @transform_8, window_bounds = array<i64: 1, 32>}, {pipeline_mode = #tpu.pipeline_mode<synchronous>, transform_indices = @transform_9, window_bounds = array<i64: 1, 32>}, {pipeline_mode = #tpu.pipeline_mode<synchronous>, transform_indices = @transform_10, window_bounds = array<i64: 1, 1>}, {transform_indices = @transform_11, window_bounds = array<i64: 1, 1, 128>}]} {
    %c0 = arith.constant 0 : index
    %c0_0 = arith.constant 0 : index
    %0 = vector.load %arg1[%c0, %c0_0] : memref<128x16xf32, #tpu.memory_space<vmem>>, vector<128x16xf32>
    %c0_1 = arith.constant 0 : index
    %c0_2 = arith.constant 0 : index
    %1 = vector.load %arg3[%c0_1, %c0_2] : memref<16x128xf32, #tpu.memory_space<vmem>>, vector<16x128xf32>
    %cst = arith.constant dense<0.000000e+00> : vector<128x128xf32>
    %2 = tpu.matmul %0, %1, %cst {dimension_numbers = #tpu.dot_dimension_numbers<[1], [0], [0], [1], [0, 0, 1, 1], [], []>} : vector<128x16xf32>, vector<16x128xf32>, vector<128x128xf32> -> vector<128x128xf32>
    %c0_3 = arith.constant 0 : index
    %c0_4 = arith.constant 0 : index
    %3 = vector.load %arg2[%c0_3, %c0_4] : memref<128x24xf32, #tpu.memory_space<vmem>>, vector<128x24xf32>
    %c0_5 = arith.constant 0 : index
    %c0_6 = arith.constant 0 : index
    %4 = vector.load %arg4[%c0_5, %c0_6] : memref<24x128xf32, #tpu.memory_space<vmem>>, vector<24x128xf32>
    %cst_7 = arith.constant dense<0.000000e+00> : vector<128x128xf32>
    %5 = tpu.matmul %3, %4, %cst_7 {dimension_numbers = #tpu.dot_dimension_numbers<[1], [0], [0], [1], [0, 0, 1, 1], [], []>} : vector<128x24xf32>, vector<24x128xf32>, vector<128x128xf32> -> vector<128x128xf32>
    %6 = arith.addf %2, %5 : vector<128x128xf32>
    %c0_8 = arith.constant 0 : index
    %c0_9 = arith.constant 0 : index
    %7 = vector.load %arg5[%c0_8, %c0_9] : memref<1x128xf32, #tpu.memory_space<vmem>>, vector<1x128xf32>
    %8 = vector.broadcast %7 : vector<1x128xf32> to vector<128x128xf32>
    %9 = arith.addf %6, %8 : vector<128x128xf32>
    %cst_10 = arith.constant 0.000000e+00 : f32
    %10 = vector.broadcast %cst_10 : f32 to vector<128x128xf32>
    %11 = arith.maximumf %9, %10 : vector<128x128xf32>
    %c0_11 = arith.constant 0 : index
    %c0_12 = arith.constant 0 : index
    %12 = vector.load %arg6[%c0_11, %c0_12] : memref<128x64xf32, #tpu.memory_space<vmem>>, vector<128x64xf32>
    %cst_13 = arith.constant dense<0.000000e+00> : vector<128x64xf32>
    %13 = tpu.matmul %11, %12, %cst_13 {dimension_numbers = #tpu.dot_dimension_numbers<[1], [0], [0], [1], [0, 0, 1, 1], [], []>} : vector<128x128xf32>, vector<128x64xf32>, vector<128x64xf32> -> vector<128x64xf32>
    %c0_14 = arith.constant 0 : index
    %c0_15 = arith.constant 0 : index
    %14 = vector.load %arg7[%c0_14, %c0_15] : memref<1x64xf32, #tpu.memory_space<vmem>>, vector<1x64xf32>
    %15 = vector.broadcast %14 : vector<1x64xf32> to vector<128x64xf32>
    %16 = arith.addf %13, %15 : vector<128x64xf32>
    %cst_16 = arith.constant 0.000000e+00 : f32
    %17 = vector.broadcast %cst_16 : f32 to vector<128x64xf32>
    %18 = arith.maximumf %16, %17 : vector<128x64xf32>
    %c0_17 = arith.constant 0 : index
    %c0_18 = arith.constant 0 : index
    %19 = vector.load %arg8[%c0_17, %c0_18] : memref<64x32xf32, #tpu.memory_space<vmem>>, vector<64x32xf32>
    %cst_19 = arith.constant dense<0.000000e+00> : vector<128x32xf32>
    %20 = tpu.matmul %18, %19, %cst_19 {dimension_numbers = #tpu.dot_dimension_numbers<[1], [0], [0], [1], [0, 0, 1, 1], [], []>} : vector<128x64xf32>, vector<64x32xf32>, vector<128x32xf32> -> vector<128x32xf32>
    %c0_20 = arith.constant 0 : index
    %c0_21 = arith.constant 0 : index
    %21 = vector.load %arg9[%c0_20, %c0_21] : memref<1x32xf32, #tpu.memory_space<vmem>>, vector<1x32xf32>
    %22 = vector.broadcast %21 : vector<1x32xf32> to vector<128x32xf32>
    %23 = arith.addf %20, %22 : vector<128x32xf32>
    %cst_22 = arith.constant 0.000000e+00 : f32
    %24 = vector.broadcast %cst_22 : f32 to vector<128x32xf32>
    %25 = arith.maximumf %23, %24 : vector<128x32xf32>
    %26 = vector.shape_cast %25 : vector<128x32xf32> to vector<1x128x32xf32>
    %c0_23 = arith.constant 0 : index
    %c0_24 = arith.constant 0 : index
    %27 = vector.load %arg10[%c0_23, %c0_24] : memref<1x32xf32, #tpu.memory_space<vmem>>, vector<1x32xf32>
    %28 = vector.shape_cast %27 : vector<1x32xf32> to vector<1x1x32xf32>
    %29 = vector.broadcast %28 : vector<1x1x32xf32> to vector<1x128x32xf32>
    %30 = arith.mulf %26, %29 : vector<1x128x32xf32>
    %cst_25 = arith.constant dense<0.000000e+00> : vector<1x128xf32>
    %31 = vector.multi_reduction <add>, %30, %cst_25 [2] : vector<1x128x32xf32> to vector<1x128xf32>
    %c0_26 = arith.constant 0 : index
    %c0_27 = arith.constant 0 : index
    %32 = vector.load %arg11[%c0_26, %c0_27] : memref<1x1xf32, #tpu.memory_space<vmem>>, vector<1x1xf32>
    %33 = vector.broadcast %32 : vector<1x1xf32> to vector<1x128xf32>
    %34 = arith.addf %31, %33 : vector<1x128xf32>
    %35 = vector.shape_cast %34 : vector<1x128xf32> to vector<1x1x128xf32>
    %c0_28 = arith.constant 0 : index
    %c0_29 = arith.constant 0 : index
    %c0_30 = arith.constant 0 : index
    %36 = vector.load %arg12[%c0_28, %c0_29, %c0_30] : memref<1x1x128xf32, #tpu.memory_space<vmem>>, vector<1x1x128xf32>
    tpu.vector_store %arg12[%c0_28, %c0_29, %c0_30], %35 {strides = array<i32>} : memref<1x1x128xf32, #tpu.memory_space<vmem>>, vector<1x1x128xf32>,
    return
  }
  func.func @transform_0(%arg0: i32) -> (i32, i32) {
    %c0_i32 = arith.constant 0 : i32
    %c0_i32_0 = arith.constant 0 : i32
    return %arg0, %c0_i32 : i32, i32
  }
  func.func @transform_1(%arg0: i32) -> (i32, i32) {
    %c0_i32 = arith.constant 0 : i32
    %c0_i32_0 = arith.constant 0 : i32
    return %arg0, %c0_i32 : i32, i32
  }
  func.func @transform_2(%arg0: i32) -> (i32, i32) {
    %c0_i32 = arith.constant 0 : i32
    %c0_i32_0 = arith.constant 0 : i32
    %c0_i32_1 = arith.constant 0 : i32
    return %c0_i32, %c0_i32_0 : i32, i32
  }
  func.func @transform_3(%arg0: i32) -> (i32, i32) {
    %c0_i32 = arith.constant 0 : i32
    %c0_i32_0 = arith.constant 0 : i32
    %c0_i32_1 = arith.constant 0 : i32
    return %c0_i32, %c0_i32_0 : i32, i32
  }
  func.func @transform_4(%arg0: i32) -> (i32, i32) {
    %c0_i32 = arith.constant 0 : i32
    %c0_i32_0 = arith.constant 0 : i32
    %c0_i32_1 = arith.constant 0 : i32
    return %c0_i32, %c0_i32_0 : i32, i32
  }
  func.func @transform_5(%arg0: i32) -> (i32, i32) {
    %c0_i32 = arith.constant 0 : i32
    %c0_i32_0 = arith.constant 0 : i32
    %c0_i32_1 = arith.constant 0 : i32
    return %c0_i32, %c0_i32_0 : i32, i32
  }
  func.func @transform_6(%arg0: i32) -> (i32, i32) {
    %c0_i32 = arith.constant 0 : i32
    %c0_i32_0 = arith.constant 0 : i32
    %c0_i32_1 = arith.constant 0 : i32
    return %c0_i32, %c0_i32_0 : i32, i32
  }
  func.func @transform_7(%arg0: i32) -> (i32, i32) {
    %c0_i32 = arith.constant 0 : i32
    %c0_i32_0 = arith.constant 0 : i32
    %c0_i32_1 = arith.constant 0 : i32
    return %c0_i32, %c0_i32_0 : i32, i32
  }
  func.func @transform_8(%arg0: i32) -> (i32, i32) {
    %c0_i32 = arith.constant 0 : i32
    %c0_i32_0 = arith.constant 0 : i32
    %c0_i32_1 = arith.constant 0 : i32
    return %c0_i32, %c0_i32_0 : i32, i32
  }
  func.func @transform_9(%arg0: i32) -> (i32, i32) {
    %c0_i32 = arith.constant 0 : i32
    %c0_i32_0 = arith.constant 0 : i32
    %c0_i32_1 = arith.constant 0 : i32
    return %c0_i32, %c0_i32_0 : i32, i32
  }
  func.func @transform_10(%arg0: i32) -> (i32, i32) {
    %c0_i32 = arith.constant 0 : i32
    %c0_i32_0 = arith.constant 0 : i32
    %c0_i32_1 = arith.constant 0 : i32
    return %c0_i32, %c0_i32_0 : i32, i32
  }
  func.func @transform_11(%arg0: i32) -> (i32, i32, i32) {
    %c0_i32 = arith.constant 0 : i32
    %c0_i32_0 = arith.constant 0 : i32
    %c0_i32_1 = arith.constant 0 : i32
    return %arg0, %c0_i32, %c0_i32_0 : i32, i32, i32
  }
}

</mosaic_0001>

<bundles_post_ra>
// kernel: ranknet_forward.1
= control target key start
LH: loop header
LB: loop body
LE: loop exit
PB: predicated region body
PF: predicated region fallthrough
CT: control target
= control target key end

     0   :  { %vm77_vm0 = vcmask 195584   ;;  %vm271_vm1 = vcmask 130048   ;;  %vm703_vm2 = vcmask 523264   ;;  %vm936_vm3 = vcmask 261120   ;;  %s1983_s3 = inlined_call_operand.vmem [shape: f32[24,128], index: 3, kind: input, shape index: {}]   ;;  %s1984_s1 = inlined_call_operand.vmem [shape: f32[8,24], index: 1, kind: input, shape index: {}]   ;;  %s1985_s2 = inlined_call_operand.vmem [shape: f32[16,128], index: 2, kind: input, shape index: {}]   ;;  %s1986_s5 = inlined_call_operand.vmem [shape: f32[128,64], index: 5, kind: input, shape index: {}]   ;;  %s1987_s0 = inlined_call_operand.vmem [shape: f32[8,16], index: 0, kind: input, shape index: {}]   ;;  %s1988_s7 = inlined_call_operand.vmem [shape: f32[64,32], index: 7, kind: input, shape index: {}]   ;;  %s1989_s4 = inlined_call_operand.vmem [shape: f32[1,128], index: 4, kind: input, shape index: {}]   ;;  %s1990_s6 = inlined_call_operand.vmem [shape: f32[1,64], index: 6, kind: input, shape index: {}]   ;;  %s1991_s10 = inlined_call_operand.<no memory space> [shape: f32[1,1], index: 10, kind: input, shape index: {}]   ;;  %s1992_s8 = inlined_call_operand.vmem [shape: f32[1,32], index: 8, kind: input, shape index: {}]   ;;  %s1993_s9 = inlined_call_operand.vmem [shape: f32[1,32], index: 9, kind: input, shape index: {}]   ;;  %s1994_s11 = inlined_call_operand.vmem [shape: f32[1,1,128], index: 11, kind: output, shape index: {}]  }
   0x1   :  { %v74_v0 = vld [vmem:[%s1983_s3] sm:$0xff]  ;;  %v75_v1 = vld [vmem:[%s1983_s3 + $0x8] sm:$0xff]  ;;  %v76_v4 = vld [vmem:[%s1983_s3 + $0x10] sm:$0xff]  ;;  %vm1038_vm4 = vcmask 130112   ;;  %vm1045_vm5 = vcmask 195712   ;;  %vm1052_vm6 = vcmask 261312  }
   0x2   :  { %v1443_v2 = vpack.c.bf16 %v75_v1, %v74_v0  ;;  %v58_v3 = vld [vmem:[%s1984_s1] sm:$0xff]  ;;  %v57_v6 = vld [vmem:[%s1985_s2 + $0x8] sm:$0xff]  ;;  %v60_v9 = vld [vmem:[%s1984_s1 + $0x10] sm:$0xff]  ;;  %vm1059_vm7 = vcmask 326912   ;;  %vm1066_vm8 = vcmask 392512   ;;  %vm1073_vm9 = vcmask 458112  }
   0x3   :  { %1295 = vmatprep.mubr.msk.f32.mxu0 %vm77_vm0, %v58_v3  ;;  %v56_v5 = vld [vmem:[%s1985_s2] sm:$0xff]  ;;  %v59_v8 = vld [vmem:[%s1984_s1 + $0x8] sm:$0xff]  ;;  %v61_v10 = vld [vmem:[%s1984_s1 + $0x18] sm:$0xff]  ;;  %vm1080_vm10 = vcmask 523712   ;;  %vm1087_vm11 = vcmask 589312   ;;  %vm1094_vm12 = vcmask 654912  }
   0x4   :  { %1444 = vmatprep.subr.bf16.mxu0 %v1443_v2  ;;  %v1447_v7 = vpack.c.bf16 %v57_v6, %v56_v5  ;;  %v62_v11 = vld [vmem:[%s1984_s1 + $0x20] sm:$0xff]  ;;  %v505_v13 = vld [vmem:[%s1986_s5 + $0x8] sm:$0xff]  ;;  %v506_v15 = vld [vmem:[%s1986_s5 + $0x10] sm:$0xff]  ;;  %vm1101_vm13 = vcmask 720512   ;;  %vm1108_vm14 = vcmask 786112   ;;  %vm1115_vm15 = vcmask 851712  }
   0x5   :  { %1446 = vmatpush3.bf16.msra.mxu0 %v1443_v2  ;;  %v504_v12 = vld [vmem:[%s1986_s5] sm:$0xff]  ;;  %v507_v16 = vld [vmem:[%s1986_s5 + $0x18] sm:$0xff]  ;;  %v63_v17 = vld [vmem:[%s1984_s1 + $0x28] sm:$0xff] }
   0x6   :  { %1293 = vmatprep.subr.mxu0 %v76_v4  ;;  %v1635_v14 = vpack.c.bf16 %v505_v13, %v504_v12  ;;  %v64_v18 = vld [vmem:[%s1984_s1 + $0x30] sm:$0xff]  ;;  %v1651_v19 = vpack.c.bf16 %v507_v16, %v506_v15  ;;  %v508_v20 = vld [vmem:[%s1986_s5 + $0x20] sm:$0xff]  ;;  %v509_v21 = vld [vmem:[%s1986_s5 + $0x28] sm:$0xff] }
   0x7   :  { %v65_v22 = vld [vmem:[%s1984_s1 + $0x38] sm:$0xff]  ;;  %v66_v23 = vld [vmem:[%s1984_s1 + $0x40] sm:$0xff]  ;;  %v1459_v24 = vpack.c.bf16 %v509_v21, %v508_v20  ;;  %v510_v25 = vld [vmem:[%s1986_s5 + $0x30] sm:$0xff] }
   0x8   :  { %1499 = vmatprep.subr.bf16.mxu1 %v1635_v14  ;;  %v511_v26 = vld [vmem:[%s1986_s5 + $0x38] sm:$0xff]  ;;  %v67_v27 = vld [vmem:[%s1984_s1 + $0x48] sm:$0xff]  ;;  %v68_v28 = vld [vmem:[%s1984_s1 + $0x50] sm:$0xff] }
   0x9   :  { %1294 = vmatpush3.msra.mxu0 %v76_v4  ;;  %1507 = vmatpush3.bf16.msra.mxu1 %v1635_v14  ;;  %v1463_v29 = vpack.c.bf16 %v511_v26, %v510_v25  ;;  %v512_v30 = vld [vmem:[%s1986_s5 + $0x40] sm:$0xff]  ;;  %v513_v31 = vld [vmem:[%s1986_s5 + $0x48] sm:$0xff]  ;;  %v69_v32 = vld [vmem:[%s1984_s1 + $0x58] sm:$0xff] }
   0xa   :  { %1296 = vmatmul.mubr.msk.f32.vlgmr.msra.gmra.mrb[0].mxu0 %vm77_vm0, %v59_v8  ;;  %1448 = vmatprep.subr.bf16.mxu0 %v1447_v7  ;;  %v70_v33 = vld [vmem:[%s1984_s1 + $0x60] sm:$0xff]  ;;  %v1467_v34 = vpack.c.bf16 %v513_v31, %v512_v30  ;;  %v514_v35 = vld [vmem:[%s1986_s5 + $0x50] sm:$0xff]  ;;  %v515_v36 = vld [vmem:[%s1986_s5 + $0x58] sm:$0xff] }
   0xb   :  { %1450 = vmatpush3.bf16.msra.mxu0 %v1447_v7  ;;  %1298 = vmatprep.mubr.msk.f32.mxu0 %vm77_vm0, %v60_v9  ;;  %v71_v37 = vld [vmem:[%s1984_s1 + $0x68] sm:$0xff]  ;;  %v72_v38 = vld [vmem:[%s1984_s1 + $0x70] sm:$0xff]  ;;  %v1471_v39 = vpack.c.bf16 %v515_v36, %v514_v35  ;;  %v516_v40 = vld [vmem:[%s1986_s5 + $0x60] sm:$0xff] }
   0xc   :  { %1452 = vmatprep.subr.bf16.mxu0 %v1635_v14  ;;  %1500 = vmatprep.subr.bf16.mxu1 %v1651_v19  ;;  %v517_v41 = vld [vmem:[%s1986_s5 + $0x68] sm:$0xff]  ;;  %v73_v42 = vld [vmem:[%s1984_s1 + $0x78] sm:$0xff]  ;;  %v40_v43 = vld [vmem:[%s1987_s0] sm:$0xff] }
   0xd   :  { %1508 = vmatpush3.bf16.msra.mxu1 %v1651_v19  ;;  %v1475_v44 = vpack.c.bf16 %v517_v41, %v516_v40  ;;  %v41_v45 = vld [vmem:[%s1987_s0 + $0x8] sm:$0xff]  ;;  %v42_v46 = vld [vmem:[%s1987_s0 + $0x10] sm:$0xff]  ;;  %v43_v47 = vld [vmem:[%s1987_s0 + $0x18] sm:$0xff] }
   0xe   :  { %1299 = vmatmul.mubr.msk.f32.gmra.mrb[2].mxu0 %vm77_vm0, %v61_v10  ;;  %1501 = vmatprep.subr.bf16.mxu1 %v1459_v24  ;;  %v44_v48 = vld [vmem:[%s1987_s0 + $0x20] sm:$0xff]  ;;  %v45_v49 = vld [vmem:[%s1987_s0 + $0x28] sm:$0xff]  ;;  %v46_v50 = vld [vmem:[%s1987_s0 + $0x30] sm:$0xff] }
   0xf   :  { %1301 = vmatprep.mubr.msk.f32.mxu0 %vm77_vm0, %v62_v11  ;;  %v47_v51 = vld [vmem:[%s1987_s0 + $0x38] sm:$0xff]  ;;  %v48_v52 = vld [vmem:[%s1987_s0 + $0x40] sm:$0xff]  ;;  %v49_v53 = vld [vmem:[%s1987_s0 + $0x48] sm:$0xff] }
  0x10   :  { %v50_v54 = vld [vmem:[%s1987_s0 + $0x50] sm:$0xff]  ;;  %v51_v55 = vld [vmem:[%s1987_s0 + $0x58] sm:$0xff]  ;;  %v52_v56 = vld [vmem:[%s1987_s0 + $0x60] sm:$0xff] }
  0x11   :  { %1509 = vmatpush3.bf16.msra.mxu1 %v1459_v24  ;;  %v53_v57 = vld [vmem:[%s1987_s0 + $0x68] sm:$0xff]  ;;  %v54_v58 = vld [vmem:[%s1987_s0 + $0x70] sm:$0xff]  ;;  %v55_v59 = vld [vmem:[%s1987_s0 + $0x78] sm:$0xff] }
  0x12   :  { %1302 = vmatmul.mubr.msk.f32.gmra.mrb[4].mxu0 %vm77_vm0, %v63_v17  ;;  %1502 = vmatprep.subr.bf16.mxu1 %v1463_v29  ;;  %v518_v60 = vld [vmem:[%s1986_s5 + $0x70] sm:$0xff]  ;;  %v519_v61 = vld [vmem:[%s1986_s5 + $0x78] sm:$0xff]  ;;  %v688_v63 = vld [vmem:[%s1988_s7] sm:$0xff] }
  0x13   :  { %1304 = vmatprep.mubr.msk.f32.mxu0 %vm77_vm0, %v64_v18  ;;  %v1479_v62 = vpack.c.bf16 %v519_v61, %v518_v60  ;;  %v689_v0 = vld [vmem:[%s1988_s7 + $0x8] sm:$0xff]  ;;  %v1807_v2 = vld [vmem:[%s1989_s4] ss:$0 sm:$0xff]  ;;  %v690_v25 = vld [vmem:[%s1988_s7 + $0x10] sm:$0xff] }
  0x14   :  { %v1483_v1 = vpack.c.bf16 %v689_v0, %v688_v63  ;;  %v691_v26 = vld [vmem:[%s1988_s7 + $0x18] sm:$0xff]  ;;  %v693_v35 = vld [vmem:[%s1988_s7 + $0x28] sm:$0xff]  ;;  %v1177_v60 = vld [vmem:[%s1990_s6] ss:$0 sm:$0xff] }
  0x15   :  { %1510 = vmatpush3.bf16.msra.mxu1 %v1463_v29 }
  0x16   :  { %1305 = vmatmul.mubr.msk.f32.gmra.mrb[6].mxu0 %vm77_vm0, %v65_v22  ;;  %1503 = vmatprep.subr.bf16.mxu1 %v1467_v34 }
  0x17   :  { %1307 = vmatprep.mubr.msk.f32.mxu0 %vm77_vm0, %v66_v23 }
  0x19   :  { %1511 = vmatpush3.bf16.msra.mxu1 %v1467_v34 }
  0x1a   :  { %1308 = vmatmul.mubr.msk.f32.gmra.mrb[8].mxu0 %vm77_vm0, %v67_v27  ;;  %1504 = vmatprep.subr.bf16.mxu1 %v1471_v39 }
  0x1b   :  { %1310 = vmatprep.mubr.msk.f32.mxu0 %vm77_vm0, %v68_v28 }
  0x1d   :  { %1512 = vmatpush3.bf16.msra.mxu1 %v1471_v39 }
  0x1e   :  { %1311 = vmatmul.mubr.msk.f32.gmra.mrb[10].mxu0 %vm77_vm0, %v69_v32  ;;  %1505 = vmatprep.subr.bf16.mxu1 %v1475_v44  ;;  %v1487_v32 = vpack.c.bf16 %v691_v26, %v690_v25 }
  0x1f   :  { %1313 = vmatprep.mubr.msk.f32.mxu0 %vm77_vm0, %v70_v33 }
  0x21   :  { %1513 = vmatpush3.bf16.msra.mxu1 %v1475_v44 }
  0x22   :  { %1314 = vmatmul.mubr.msk.f32.gmra.mrb[12].mxu0 %vm77_vm0, %v71_v37  ;;  %1506 = vmatprep.subr.bf16.mxu1 %v1479_v62 }
  0x23   :  { %1316 = vmatprep.mubr.msk.f32.mxu0 %vm77_vm0, %v72_v38 }
  0x25   :  { %1514 = vmatpush3.bf16.msra.mxu1 %v1479_v62 }
  0x26   :  { %1317 = vmatmul.mubr.msk.f32.gmra.mrb[14].mxu0 %vm77_vm0, %v73_v42  ;;  %1484 = vmatprep.subr.bf16.mxu1 %v1483_v1  ;;  %vm1122_vm0 = vcmask 917312  }
  0x27   :  { %1323 = vmatprep.mubr.msk.f32.mxu0 %vm271_vm1, %v40_v43 }
  0x2a   :  { %1324 = vmatmul.mubr.msk.f32.vlgmr.msra.gmra.mrb[0].mxu0 %vm271_vm1, %v41_v45 }
  0x2b   :  { %1326 = vmatprep.mubr.msk.f32.mxu0 %vm271_vm1, %v42_v46  ;;  %1454 = vmatpush3.bf16.msra.mxu0 %v1635_v14 }
  0x2c   :  { %1456 = vmatprep.subr.bf16.mxu0 %v1651_v19 }
  0x2e   :  { %1327 = vmatmul.mubr.msk.f32.gmra.mrb[2].mxu0 %vm271_vm1, %v43_v47 }
  0x2f   :  { %1329 = vmatprep.mubr.msk.f32.mxu0 %vm271_vm1, %v44_v48  ;;  %1458 = vmatpush3.bf16.msra.mxu0 %v1651_v19 }
  0x30   :  { %1460 = vmatprep.subr.bf16.mxu0 %v1459_v24 }
  0x32   :  { %1330 = vmatmul.mubr.msk.f32.gmra.mrb[4].mxu0 %vm271_vm1, %v45_v49 }
  0x33   :  { %1332 = vmatprep.mubr.msk.f32.mxu0 %vm271_vm1, %v46_v50  ;;  %1462 = vmatpush3.bf16.msra.mxu0 %v1459_v24 }
  0x34   :  { %1464 = vmatprep.subr.bf16.mxu0 %v1463_v29 }
  0x36   :  { %1333 = vmatmul.mubr.msk.f32.gmra.mrb[6].mxu0 %vm271_vm1, %v47_v51 }
  0x37   :  { %1335 = vmatprep.mubr.msk.f32.mxu0 %vm271_vm1, %v48_v52  ;;  %1466 = vmatpush3.bf16.msra.mxu0 %v1463_v29 }
  0x38   :  { %1468 = vmatprep.subr.bf16.mxu0 %v1467_v34 }
  0x3a   :  { %1336 = vmatmul.mubr.msk.f32.gmra.mrb[8].mxu0 %vm271_vm1, %v49_v53 }
  0x3b   :  { %1338 = vmatprep.mubr.msk.f32.mxu0 %vm271_vm1, %v50_v54  ;;  %1470 = vmatpush3.bf16.msra.mxu0 %v1467_v34  ;;  %v692_v34 = vld [vmem:[%s1988_s7 + $0x20] sm:$0xff] }
  0x3c   :  { %1472 = vmatprep.subr.bf16.mxu0 %v1471_v39  ;;  %v1491_v41 = vpack.c.bf16 %v693_v35, %v692_v34 }
  0x3e   :  { %1339 = vmatmul.mubr.msk.f32.gmra.mrb[10].mxu0 %vm271_vm1, %v51_v55 }
  0x3f   :  { %1341 = vmatprep.mubr.msk.f32.mxu0 %vm271_vm1, %v52_v56  ;;  %1474 = vmatpush3.bf16.msra.mxu0 %v1471_v39 }
  0x40   :  { %1476 = vmatprep.subr.bf16.mxu0 %v1475_v44 }
  0x42   :  { %1342 = vmatmul.mubr.msk.f32.gmra.mrb[12].mxu0 %vm271_vm1, %v53_v57  ;;  %v694_v57 = vld [vmem:[%s1988_s7 + $0x30] sm:$0xff] }
  0x43   :  { %1344 = vmatprep.mubr.msk.f32.mxu0 %vm271_vm1, %v54_v58  ;;  %1478 = vmatpush3.bf16.msra.mxu0 %v1475_v44  ;;  %v695_v58 = vld [vmem:[%s1988_s7 + $0x38] sm:$0xff] }
  0x44   :  { %1480 = vmatprep.subr.bf16.mxu0 %v1479_v62 }
  0x46   :  { %1345 = vmatmul.mubr.msk.f32.gmra.mrb[14].mxu0 %vm271_vm1, %v55_v59  ;;  %v1495_v59 = vpack.c.bf16 %v695_v58, %v694_v57  ;;  %vm1129_vm1 = vcmask 982912  }
  0x47   :  { %1482 = vmatpush3.bf16.msra.mxu0 %v1479_v62 }
  0xfd   :  { %v1325_v3 = vpop.f32.mrb[0].mxu0 }
  0xfe   :  { %v473_v4 = vadd.f32 %v1325_v3, %v1807_v2  ;;  %v386_v5 = vpop.f32.mrb[1].mxu0 }
  0xff   :  { %v472_v6 = vadd.f32 %v1807_v2, %v386_v5 }
 0x100   :  { %v489_v9 = vmax.f32 %v473_v4, 0.0 }
 0x101   :  { %v488_v7 = vmax.f32 %v472_v6, 0.0  ;;  %v1328_v8 = vpop.f32.mrb[2].mxu0 }
 0x102   :  { %v475_v10 = vadd.f32 %v1328_v8, %v1807_v2  ;;  %v396_v11 = vpop.f32.mrb[3].mxu0 }
 0x103   :  { %v474_v12 = vadd.f32 %v1807_v2, %v396_v11  ;;  %1379 = vmatprep.mubr.f32.mxu0 %v488_v7 }
 0x104   :  { %1380 = vmatmul.mubr.f32.vlgmr.msra.gmra.mrb[16].mxu0 %v489_v9  ;;  %v491_v15 = vmax.f32 %v475_v10, 0.0 }
 0x105   :  { %v490_v13 = vmax.f32 %v474_v12, 0.0  ;;  %v1331_v14 = vpop.f32.mrb[4].mxu0 }
 0x106   :  { %v477_v16 = vadd.f32 %v1331_v14, %v1807_v2  ;;  %v406_v17 = vpop.f32.mrb[5].mxu0 }
 0x107   :  { %v476_v18 = vadd.f32 %v1807_v2, %v406_v17  ;;  %1382 = vmatprep.mubr.f32.mxu0 %v490_v13 }
 0x108   :  { %1383 = vmatmul.mubr.f32.gmra.mrb[18].mxu0 %v491_v15  ;;  %v493_v21 = vmax.f32 %v477_v16, 0.0 }
 0x109   :  { %v492_v19 = vmax.f32 %v476_v18, 0.0  ;;  %v1334_v20 = vpop.f32.mrb[6].mxu0 }
 0x10a   :  { %v479_v22 = vadd.f32 %v1334_v20, %v1807_v2  ;;  %v416_v23 = vpop.f32.mrb[7].mxu0 }
 0x10b   :  { %1385 = vmatprep.mubr.f32.mxu0 %v492_v19  ;;  %v478_v24 = vadd.f32 %v1807_v2, %v416_v23 }
 0x10c   :  { %1386 = vmatmul.mubr.f32.gmra.mrb[20].mxu0 %v493_v21  ;;  %v495_v29 = vmax.f32 %v479_v22, 0.0 }
 0x10d   :  { %v1337_v27 = vpop.f32.mrb[8].mxu0  ;;  %v494_v28 = vmax.f32 %v478_v24, 0.0 }
 0x10e   :  { %v481_v30 = vadd.f32 %v1337_v27, %v1807_v2  ;;  %v426_v31 = vpop.f32.mrb[9].mxu0 }
 0x10f   :  { %v480_v33 = vadd.f32 %v1807_v2, %v426_v31  ;;  %1388 = vmatprep.mubr.f32.mxu1 %v494_v28 }
 0x110   :  { %1389 = vmatmul.mubr.f32.vlgmr.msra.gmra.mrb[0].mxu1 %v495_v29  ;;  %v497_v38 = vmax.f32 %v481_v30, 0.0 }
 0x111   :  { %v496_v36 = vmax.f32 %v480_v33, 0.0  ;;  %v1340_v37 = vpop.f32.mrb[10].mxu0  ;;  %1486 = vmatpush3.bf16.msra.mxu1 %v1483_v1 }
 0x112   :  { %v483_v39 = vadd.f32 %v1340_v37, %v1807_v2  ;;  %v436_v40 = vpop.f32.mrb[11].mxu0  ;;  %1488 = vmatprep.subr.bf16.mxu1 %v1487_v32 }
 0x113   :  { %v482_v42 = vadd.f32 %v1807_v2, %v436_v40  ;;  %1391 = vmatprep.mubr.f32.mxu1 %v496_v36 }
 0x114   :  { %1392 = vmatmul.mubr.f32.gmra.mrb[2].mxu1 %v497_v38  ;;  %v499_v45 = vmax.f32 %v483_v39, 0.0 }
 0x115   :  { %v498_v43 = vmax.f32 %v482_v42, 0.0  ;;  %v1343_v44 = vpop.f32.mrb[12].mxu0  ;;  %1490 = vmatpush3.bf16.msra.mxu1 %v1487_v32 }
 0x116   :  { %v485_v46 = vadd.f32 %v1343_v44, %v1807_v2  ;;  %v446_v47 = vpop.f32.mrb[13].mxu0  ;;  %1492 = vmatprep.subr.bf16.mxu1 %v1491_v41 }
 0x117   :  { %v484_v48 = vadd.f32 %v1807_v2, %v446_v47  ;;  %1394 = vmatprep.mubr.f32.mxu1 %v498_v43  ;;  %v1868_v47 = vld [vmem:[%s1992_s8] ss:$0 sm:$0xff] }
 0x118   :  { %1395 = vmatmul.mubr.f32.gmra.mrb[4].mxu1 %v499_v45  ;;  %v501_v51 = vmax.f32 %v485_v46, 0.0  ;;  %v16_v45 = vstv %s1991_s10  ;;  %v1534_v46 = vmov 0  }
 0x119   :  { %v500_v49 = vmax.f32 %v484_v48, 0.0  ;;  %v1346_v50 = vpop.f32.mrb[14].mxu0  ;;  %1494 = vmatpush3.bf16.msra.mxu1 %v1491_v41  ;;  %17 = vst [vmem:[#allocation2] sm:$0x1] %v16_v45  ;;  %1532 = vset.pattern.permute.xlu1 %v1534_v46 }
 0x11a   :  { %v487_v52 = vadd.f32 %v1346_v50, %v1807_v2  ;;  %v456_v53 = vpop.f32.mrb[15].mxu0  ;;  %1496 = vmatprep.subr.bf16.mxu1 %v1495_v59  ;;  %1533 = vset.pattern.permute.xlu0 %v1534_v46 }
 0x11b   :  { %v486_v54 = vadd.f32 %v1807_v2, %v456_v53  ;;  %1397 = vmatprep.mubr.f32.mxu1 %v500_v49 }
 0x11c   :  { %1398 = vmatmul.mubr.f32.gmra.mrb[6].mxu1 %v501_v51  ;;  %v503_v56 = vmax.f32 %v487_v52, 0.0  ;;  %v1875_v52 = vld [vmem:[%s1993_s9] ss:$0 sm:$0xff] }
 0x11d   :  { %v502_v55 = vmax.f32 %v486_v54, 0.0  ;;  %1498 = vmatpush3.bf16.msra.mxu1 %v1495_v59 }
 0x11f   :  { %1400 = vmatprep.mubr.f32.mxu1 %v502_v55 }
 0x120   :  { %1401 = vmatmul.mubr.f32.gmra.mrb[8].mxu1 %v503_v56 }
 0x1d7   :  { %v1381_v61 = vpop.f32.mrb[16].mxu0 }
 0x1d8   :  { %v599_v62 = vadd.f32 %v1381_v61, %v1177_v60  ;;  %v593_v63 = vpop.f32.mrb[17].mxu0 }
 0x1d9   :  { %v594_v0 = vadd.f32 %v1177_v60, %v593_v63 }
 0x1da   :  { %v673_v3 = vmax.f32 %v599_v62, 0.0 }
 0x1db   :  { %v672_v1 = vmax.f32 %v594_v0, 0.0  ;;  %v1384_v2 = vpop.f32.mrb[18].mxu0 }
 0x1dc   :  { %v609_v4 = vadd.f32 %v1384_v2, %v1177_v60  ;;  %v603_v5 = vpop.f32.mrb[19].mxu0 }
 0x1dd   :  { %v604_v6 = vadd.f32 %v1177_v60, %v603_v5  ;;  %1419 = vmatprep.mubr.msk.f32.mxu1 %vm703_vm2, %v672_v1 }
 0x1de   :  { %1420 = vmatmul.mubr.msk.f32.vlgmr.msra.gmra.mrb[10].mxu1 %vm703_vm2, %v673_v3  ;;  %v675_v9 = vmax.f32 %v609_v4, 0.0 }
 0x1df   :  { %v674_v7 = vmax.f32 %v604_v6, 0.0  ;;  %v1387_v8 = vpop.f32.mrb[20].mxu0 }
 0x1e0   :  { %v619_v10 = vadd.f32 %v1387_v8, %v1177_v60  ;;  %v613_v11 = vpop.f32.mrb[21].mxu0 }
 0x1e1   :  { %v614_v12 = vadd.f32 %v1177_v60, %v613_v11  ;;  %1422 = vmatprep.mubr.msk.f32.mxu1 %vm703_vm2, %v674_v7 }
 0x1e2   :  { %1423 = vmatmul.mubr.msk.f32.gmra.mrb[12].mxu1 %vm703_vm2, %v675_v9  ;;  %v677_v15 = vmax.f32 %v619_v10, 0.0 }
 0x1e3   :  { %v676_v13 = vmax.f32 %v614_v12, 0.0  ;;  %v1390_v14 = vpop.f32.mrb[0].mxu1 }
 0x1e4   :  { %v629_v16 = vadd.f32 %v1390_v14, %v1177_v60  ;;  %v623_v17 = vpop.f32.mrb[1].mxu1 }
 0x1e5   :  { %v624_v18 = vadd.f32 %v1177_v60, %v623_v17  ;;  %1425 = vmatprep.mubr.msk.f32.mxu1 %vm703_vm2, %v676_v13 }
 0x1e6   :  { %1426 = vmatmul.mubr.msk.f32.gmra.mrb[14].mxu1 %vm703_vm2, %v677_v15  ;;  %v679_v21 = vmax.f32 %v629_v16, 0.0 }
 0x1e7   :  { %v678_v19 = vmax.f32 %v624_v18, 0.0  ;;  %v1393_v20 = vpop.f32.mrb[2].mxu1 }
 0x1e8   :  { %v639_v22 = vadd.f32 %v1393_v20, %v1177_v60  ;;  %v633_v23 = vpop.f32.mrb[3].mxu1 }
 0x1e9   :  { %v634_v24 = vadd.f32 %v1177_v60, %v633_v23  ;;  %1428 = vmatprep.mubr.msk.f32.mxu1 %vm703_vm2, %v678_v19 }
 0x1ea   :  { %1429 = vmatmul.mubr.msk.f32.gmra.mrb[16].mxu1 %vm703_vm2, %v679_v21  ;;  %v681_v27 = vmax.f32 %v639_v22, 0.0 }
 0x1eb   :  { %v680_v25 = vmax.f32 %v634_v24, 0.0  ;;  %v1396_v26 = vpop.f32.mrb[4].mxu1 }
 0x1ec   :  { %v649_v28 = vadd.f32 %v1396_v26, %v1177_v60  ;;  %v643_v29 = vpop.f32.mrb[5].mxu1 }
 0x1ed   :  { %v644_v30 = vadd.f32 %v1177_v60, %v643_v29  ;;  %1431 = vmatprep.mubr.msk.f32.mxu1 %vm703_vm2, %v680_v25 }
 0x1ee   :  { %1432 = vmatmul.mubr.msk.f32.gmra.mrb[18].mxu1 %vm703_vm2, %v681_v27  ;;  %v683_v33 = vmax.f32 %v649_v28, 0.0 }
 0x1ef   :  { %v682_v31 = vmax.f32 %v644_v30, 0.0  ;;  %v1399_v32 = vpop.f32.mrb[6].mxu1 }
 0x1f0   :  { %v659_v34 = vadd.f32 %v1399_v32, %v1177_v60  ;;  %v653_v35 = vpop.f32.mrb[7].mxu1 }
 0x1f1   :  { %v654_v36 = vadd.f32 %v1177_v60, %v653_v35  ;;  %1434 = vmatprep.mubr.msk.f32.mxu1 %vm703_vm2, %v682_v31 }
 0x1f2   :  { %1435 = vmatmul.mubr.msk.f32.gmra.mrb[20].mxu1 %vm703_vm2, %v683_v33  ;;  %v685_v39 = vmax.f32 %v659_v34, 0.0 }
 0x1f3   :  { %v684_v37 = vmax.f32 %v654_v36, 0.0  ;;  %v1402_v38 = vpop.f32.mrb[8].mxu1 }
 0x1f4   :  { %v669_v40 = vadd.f32 %v1402_v38, %v1177_v60  ;;  %v663_v41 = vpop.f32.mrb[9].mxu1 }
 0x1f5   :  { %v664_v42 = vadd.f32 %v1177_v60, %v663_v41  ;;  %1437 = vmatprep.mubr.msk.f32.mxu1 %vm703_vm2, %v684_v37 }
 0x1f6   :  { %1438 = vmatmul.mubr.msk.f32.gmra.mrb[22].mxu1 %vm703_vm2, %v685_v39  ;;  %v687_v44 = vmax.f32 %v669_v40, 0.0 }
 0x1f7   :  { %v686_v43 = vmax.f32 %v664_v42, 0.0 }
 0x1f9   :  { %1440 = vmatprep.mubr.msk.f32.mxu1 %vm703_vm2, %v686_v43 }
 0x1fa   :  { %1441 = vmatmul.mubr.msk.f32.gmra.mrb[24].mxu1 %vm703_vm2, %v687_v44  ;;  %vm1136_vm2 = vcmask 1048512  }
 0x2b1   :  { %v1421_v48 = vpop.f32.mrb[10].mxu1 }
 0x2b2   :  { %v824_v49 = vadd.f32 %v1421_v48, %v1868_v47  ;;  %v818_v50 = vpop.f32.mrb[11].mxu1 }
 0x2b3   :  { %v819_v51 = vadd.f32 %v1868_v47, %v818_v50 }
 0x2b4   :  { %v898_v53 = vmax.f32 %v824_v49, 0.0 }
 0x2b5   :  { %v897_v54 = vmax.f32 %v819_v51, 0.0  ;;  %v1424_v55 = vpop.f32.mrb[12].mxu1 }
 0x2b6   :  { %v834_v56 = vadd.f32 %v1424_v55, %v1868_v47  ;;  %v828_v57 = vpop.f32.mrb[13].mxu1  ;;  %v921_v58 = vmul.f32 %v1875_v52, %v898_v53  ;;  %v985_v53 = vld [vmem:[#allocation2] sm:$0x1] }
 0x2b7   :  { %v829_v59 = vadd.f32 %v1868_v47, %v828_v57  ;;  %v920_v62 = vmul.f32 %v1875_v52, %v897_v54 }
 0x2b8   :  { %v900_v60 = vmax.f32 %v834_v56, 0.0  ;;  %v940_v61 = vsel %vm936_vm3, %v921_v58, 0.0 }
 0x2b9   :  { %v899_v63 = vmax.f32 %v829_v59, 0.0  ;;  %941 = vadd.xlane.f32.xlu0 %v940_v61  ;;  %v1427_v0 = vpop.f32.mrb[14].mxu1  ;;  %v937_v7 = vsel %vm936_vm3, %v920_v62, 0.0 }
 0x2ba   :  { %v844_v1 = vadd.f32 %v1427_v0, %v1868_v47  ;;  %v838_v2 = vpop.f32.mrb[15].mxu1  ;;  %v923_v3 = vmul.f32 %v1875_v52, %v900_v60 }
 0x2bb   :  { %v839_v4 = vadd.f32 %v1868_v47, %v838_v2  ;;  %v922_v8 = vmul.f32 %v1875_v52, %v899_v63 }
 0x2bc   :  { %v902_v5 = vmax.f32 %v844_v1, 0.0  ;;  %v946_v6 = vsel %vm936_vm3, %v923_v3, 0.0 }
 0x2bd   :  { %v901_v9 = vmax.f32 %v839_v4, 0.0  ;;  %947 = vadd.xlane.f32.xlu1 %v946_v6  ;;  %v1430_v10 = vpop.f32.mrb[16].mxu1  ;;  %938 = vadd.xlane.f32.xlu0 %v937_v7  ;;  %v943_v16 = vsel %vm936_vm3, %v922_v8, 0.0 }
 0x2be   :  { %v854_v11 = vadd.f32 %v1430_v10, %v1868_v47  ;;  %v848_v12 = vpop.f32.mrb[17].mxu1  ;;  %v925_v17 = vmul.f32 %v1875_v52, %v902_v5 }
 0x2bf   :  { %v849_v13 = vadd.f32 %v1868_v47, %v848_v12  ;;  %v924_v14 = vmul.f32 %v1875_v52, %v901_v9  ;;  %v991_v9 = vlaneseq }
 0x2c0   :  { %v904_v15 = vmax.f32 %v854_v11, 0.0  ;;  %v952_v24 = vsel %vm936_vm3, %v925_v17, 0.0 }
 0x2c1   :  { %v903_v18 = vmax.f32 %v849_v13, 0.0  ;;  %v1433_v19 = vpop.f32.mrb[18].mxu1  ;;  %944 = vadd.xlane.f32.xlu1 %v943_v16  ;;  %v949_v20 = vsel %vm936_vm3, %v924_v14, 0.0  ;;  %v1923_v12 = vshrl.u32 %v991_v9, 7  ;;  %v1926_v14 = vand.u32 127, %v991_v9 }
 0x2c2   :  { %v864_v21 = vadd.f32 %v1433_v19, %v1868_v47  ;;  %v858_v22 = vpop.f32.mrb[19].mxu1  ;;  %950 = vadd.xlane.f32.xlu0 %v949_v20  ;;  %v927_v23 = vmul.f32 %v1875_v52, %v904_v15 }
 0x2c3   :  { %v859_v27 = vadd.f32 %v1868_v47, %v858_v22  ;;  %v926_v29 = vmul.f32 %v1875_v52, %v903_v18  ;;  %v993_v13 = vsub.s32 0, %v1923_v12  ;;  %v1033_v17 = vadd.s32 4294967288, %v1926_v14 }
 0x2c4   :  { %v958_v25 = vsel %vm936_vm3, %v927_v23, 0.0  ;;  %v906_v26 = vmax.f32 %v864_v21, 0.0  ;;  %v1040_v18 = vadd.s32 4294967280, %v1926_v14  ;;  %v1031_v22 = vsub.s32 %v1926_v14, %v1923_v12 }
 0x2c5   :  { %v1436_v28 = vpop.f32.mrb[20].mxu1  ;;  %953 = vadd.xlane.f32.xlu1 %v952_v24  ;;  %v905_v33 = vmax.f32 %v859_v27, 0.0  ;;  %v955_v36 = vsel %vm936_vm3, %v926_v29, 0.0  ;;  %v1036_v23 = vsub.s32 %v1033_v17, %v1923_v12  ;;  %v1117_v9 = vadd.s32 4294967192, %v1926_v14 }
 0x2c6   :  { %v874_v30 = vadd.f32 %v1436_v28, %v1868_v47  ;;  %v868_v31 = vpop.f32.mrb[21].mxu1  ;;  %959 = vadd.xlane.f32.xlu0 %v958_v25  ;;  %v929_v37 = vmul.f32 %v1875_v52, %v906_v26  ;;  %v1043_v25 = vsub.s32 %v1040_v18, %v1923_v12  ;;  %v1047_v28 = vadd.s32 4294967272, %v1926_v14 }
 0x2c7   :  { %v869_v34 = vadd.f32 %v1868_v47, %v868_v31  ;;  %v928_v45 = vmul.f32 %v1875_v52, %v905_v33  ;;  %v1054_v31 = vadd.s32 4294967264, %v1926_v14 }
 0x2c8   :  { %v908_v32 = vmax.f32 %v874_v30, 0.0  ;;  %v964_v44 = vsel %vm936_vm3, %v929_v37, 0.0 }
 0x2c9   :  { %v1439_v35 = vpop.f32.mrb[22].mxu1  ;;  %v907_v41 = vmax.f32 %v869_v34, 0.0  ;;  %v961_v50 = vsel %vm936_vm3, %v928_v45, 0.0  ;;  %v1050_v34 = vsub.s32 %v1047_v28, %v1923_v12 }
 0x2ca   :  { %v878_v38 = vpop.f32.mrb[23].mxu1  ;;  %956 = vadd.xlane.f32.xlu0 %v955_v36  ;;  %v931_v39 = vmul.f32 %v1875_v52, %v908_v32  ;;  %v884_v42 = vadd.f32 %v1439_v35, %v1868_v47  ;;  %v1061_v35 = vadd.s32 4294967256, %v1926_v14 }
 0x2cb   :  { %v879_v49 = vadd.f32 %v1868_v47, %v878_v38  ;;  %v930_v51 = vmul.f32 %v1875_v52, %v907_v41  ;;  %v1057_v38 = vsub.s32 %v1054_v31, %v1923_v12  ;;  %v1068_v41 = vadd.s32 4294967248, %v1926_v14 }
 0x2cc   :  { %v970_v40 = vsel %vm936_vm3, %v931_v39, 0.0  ;;  %v910_v48 = vmax.f32 %v884_v42, 0.0 }
 0x2cd   :  { %v1442_v43 = vpop.f32.mrb[24].mxu1  ;;  %v909_v54 = vmax.f32 %v879_v49, 0.0  ;;  %v967_v56 = vsel %vm936_vm3, %v930_v51, 0.0  ;;  %v1082_v51 = vadd.s32 4294967232, %v1926_v14 }
 0x2ce   :  { %965 = vadd.xlane.f32.xlu0 %v964_v44  ;;  %v888_v46 = vpop.f32.mrb[25].mxu1  ;;  %v933_v57 = vmul.f32 %v1875_v52, %v910_v48  ;;  %v894_v58 = vadd.f32 %v1442_v43, %v1868_v47  ;;  %v1064_v44 = vsub.s32 %v1061_v35, %v1923_v12  ;;  %v1075_v48 = vadd.s32 4294967240, %v1926_v14 }
 0x2cf   :  { %v889_v55 = vadd.f32 %v1868_v47, %v888_v46  ;;  %v932_v61 = vmul.f32 %v1875_v52, %v909_v54  ;;  %v1071_v46 = vsub.s32 %v1068_v41, %v1923_v12 }
 0x2d0   :  { %v976_v60 = vsel %vm936_vm3, %v933_v57, 0.0  ;;  %v912_v62 = vmax.f32 %v894_v58, 0.0  ;;  %v1078_v58 = vsub.s32 %v1075_v48, %v1923_v12 }
 0x2d1   :  { %v911_v59 = vmax.f32 %v889_v55, 0.0  ;;  %v973_v63 = vsel %vm936_vm3, %v932_v61, 0.0  ;;  %v1089_v55 = vadd.s32 4294967224, %v1926_v14 }
 0x2d2   :  { %962 = vadd.xlane.f32.xlu0 %v961_v50  ;;  %v935_v2 = vmul.f32 %v1875_v52, %v912_v62  ;;  %v1096_v62 = vadd.s32 4294967216, %v1926_v14 }
 0x2d3   :  { %v934_v0 = vmul.f32 %v1875_v52, %v911_v59 }
 0x2d4   :  { %v982_v3 = vsel %vm936_vm3, %v935_v2, 0.0 }
 0x2d5   :  { %v979_v1 = vsel %vm936_vm3, %v934_v0, 0.0 }
 0x2d6   :  { %988 = vperm.xlu1 %1532, %v985_v53   ;;  %968 = vadd.xlane.f32.xlu0 %v967_v56 }
 0x2da   :  { %977 = vadd.xlane.f32.xlu0 %v976_v60  ;;  %v1085_v60 = vsub.s32 %v1082_v51, %v1923_v12 }
 0x2de   :  { %974 = vadd.xlane.f32.xlu0 %v973_v63 }
 0x2e2   :  { %980 = vadd.xlane.f32.xlu0 %v979_v1  ;;  %v1092_v1 = vsub.s32 %v1089_v55, %v1923_v12 }
 0x2e6   :  { %983 = vadd.xlane.f32.xlu0 %v982_v3  ;;  %v1103_v3 = vadd.s32 4294967208, %v1926_v14 }
 0x2fa   :  { %971 = vadd.xlane.f32.xlu1 %v970_v40 }
 0x346   :  { %v942_v47 = vpop.xlane.xlu0 %941 }
 0x34a   :  { %v939_v4 = vpop.xlane.xlu0 %938  ;;  %v948_v5 = vpop.xlane.xlu1 %947 }
 0x34e   :  { %v945_v7 = vpop.xlane.xlu1 %944 }
 0x34f   :  { %v951_v6 = vpop.xlane.xlu0 %950 }
 0x352   :  { %v954_v10 = vpop.xlane.xlu1 %953 }
 0x353   :  { %v960_v8 = vpop.xlane.xlu0 %959 }
 0x356   :  { %v989_v52 = vpop.permute.xlu1 %988 }
 0x357   :  { %v957_v11 = vpop.xlane.xlu0 %956  ;;  %v1928_v16 = vrot.slane %v989_v52, %v993_v13  ;;  %v1106_v13 = vsub.s32 %v1103_v3, %v1923_v12 }
 0x359   :  { %v995_v20 = vadd.f32 %v1928_v16, %v939_v4  ;;  %v996_v21 = vadd.f32 %v1928_v16, %v942_v47  ;;  %v997_v24 = vadd.f32 %v1928_v16, %v945_v7  ;;  %v998_v32 = vadd.f32 %v1928_v16, %v948_v5 }
 0x35a   :  { %v999_v36 = vadd.f32 %v1928_v16, %v951_v6  ;;  %v1000_v42 = vadd.f32 %v1928_v16, %v954_v10  ;;  %v1001_v50 = vadd.f32 %v1928_v16, %v957_v11  ;;  %v1002_v57 = vadd.f32 %v1928_v16, %v960_v8 }
 0x35b   :  { %v966_v15 = vpop.xlane.xlu0 %965  ;;  %v1032_v26 = vrot.slane %v995_v20, %v1031_v22  ;;  %v1037_v27 = vrot.slane %v996_v21, %v1036_v23  ;;  %v1044_v30 = vrot.slane %v997_v24, %v1043_v25  ;;  %v1051_v40 = vrot.slane %v998_v32, %v1050_v34 }
 0x35c   :  { %v1058_v45 = vrot.slane %v999_v36, %v1057_v38  ;;  %v1065_v54 = vrot.slane %v1000_v42, %v1064_v44  ;;  %v1072_v59 = vrot.slane %v1001_v50, %v1071_v46  ;;  %v1079_v2 = vrot.slane %v1002_v57, %v1078_v58 }
 0x35d   :  { %v1039_v33 = vsel %vm1038_vm4, %v1037_v27, %v1032_v26  ;;  %v1099_v4 = vsub.s32 %v1096_v62, %v1923_v12  ;;  %v1110_v6 = vadd.s32 4294967200, %v1926_v14  ;;  %v1004_v7 = vadd.f32 %v1928_v16, %v966_v15 }
 0x35e   :  { %v1046_v37 = vsel %vm1045_vm5, %v1044_v30, %v1039_v33  ;;  %v1124_v10 = vadd.s32 4294967184, %v1926_v14  ;;  %v1131_v11 = vadd.s32 4294967176, %v1926_v14  ;;  %v1120_v22 = vsub.s32 %v1117_v9, %v1923_v12 }
 0x35f   :  { %v963_v19 = vpop.xlane.xlu0 %962  ;;  %v1053_v43 = vsel %vm1052_vm6, %v1051_v40, %v1046_v37  ;;  %v1113_v18 = vsub.s32 %v1110_v6, %v1923_v12  ;;  %v1093_v21 = vrot.slane %v1004_v7, %v1092_v1 }
 0x360   :  { %v1060_v49 = vsel %vm1059_vm7, %v1058_v45, %v1053_v43  ;;  %v1003_v61 = vadd.f32 %v1928_v16, %v963_v19  ;;  %v1127_v14 = vsub.s32 %v1124_v10, %v1923_v12  ;;  %v1134_v26 = vsub.s32 %v1131_v11, %v1923_v12 }
 0x361   :  { %v1067_v56 = vsel %vm1066_vm8, %v1065_v54, %v1060_v49 }
 0x362   :  { %v1074_v63 = vsel %vm1073_vm9, %v1072_v59, %v1067_v56  ;;  %v1086_v47 = vrot.slane %v1003_v61, %v1085_v60 }
 0x363   :  { %v969_v29 = vpop.xlane.xlu0 %968  ;;  %v1081_v8 = vsel %vm1080_vm10, %v1079_v2, %v1074_v63 }
 0x364   :  { %v1005_v5 = vadd.f32 %v1928_v16, %v969_v29  ;;  %v1088_v52 = vsel %vm1087_vm11, %v1086_v47, %v1081_v8 }
 0x365   :  { %v1095_v27 = vsel %vm1094_vm12, %v1093_v21, %v1088_v52 }
 0x366   :  { %v1100_v17 = vrot.slane %v1005_v5, %v1099_v4 }
 0x367   :  { %v978_v39 = vpop.xlane.xlu0 %977 }
 0x368   :  { %v1008_v23 = vadd.f32 %v1928_v16, %v978_v39  ;;  %v1102_v30 = vsel %vm1101_vm13, %v1100_v17, %v1095_v27 }
 0x36a   :  { %v1121_v32 = vrot.slane %v1008_v23, %v1120_v22 }
 0x36b   :  { %v975_v53 = vpop.xlane.xlu0 %974 }
 0x36c   :  { %v1007_v19 = vadd.f32 %v1928_v16, %v975_v53 }
 0x36e   :  { %v1114_v31 = vrot.slane %v1007_v19, %v1113_v18 }
 0x36f   :  { %v981_v0 = vpop.xlane.xlu0 %980 }
 0x370   :  { %v1009_v25 = vadd.f32 %v1928_v16, %v981_v0 }
 0x372   :  { %v1128_v34 = vrot.slane %v1009_v25, %v1127_v14 }
 0x373   :  { %v984_v20 = vpop.xlane.xlu0 %983 }
 0x374   :  { %v1010_v28 = vadd.f32 %v1928_v16, %v984_v20 }
 0x376   :  { %v1135_v36 = vrot.slane %v1010_v28, %v1134_v26 }
 0x387   :  { %v972_v15 = vpop.xlane.xlu1 %971 }
 0x388   :  { %v1006_v24 = vadd.f32 %v1928_v16, %v972_v15 }
 0x38a   :  { %v1107_v29 = vrot.slane %v1006_v24, %v1106_v13 }
 0x38c   :  { %v1109_v33 = vsel %vm1108_vm14, %v1107_v29, %v1102_v30 }
 0x38d   :  { %v1116_v35 = vsel %vm1115_vm15, %v1114_v31, %v1109_v33 }
 0x38e   :  { %v1123_v37 = vsel %vm1122_vm0, %v1121_v32, %v1116_v35 }
 0x38f   :  { %v1130_v12 = vsel %vm1129_vm1, %v1128_v34, %v1123_v37 }
 0x390   :  { %v1137_v38 = vsel %vm1136_vm2, %v1135_v36, %v1130_v12 }
 0x391   :  { %1139 = vst [vmem:[%s1994_s11] sm:$0x1] %v1137_v38 }

</bundles_post_ra>
